<compile_context>
chip_gen: v7x
topology: tpu7x:2x2x1
jax: 0.10.0
libtpu: 0.0.40
codegen_flags: <defaults>
</compile_context>

<pallas_src>
import math
import jax
import jax.numpy as jnp
from jax import lax
from jax.experimental import pallas as pl
from jax.experimental.pallas import tpu as pltpu


def _pick_tile(n, candidates=(512, 256, 128)):
    for c in candidates:
        if n % c == 0:
            return c
    return n


# --------------------------------------------------------------------------------------
# value_proj: standalone tiled matmul kernel (bf16 MXU operands, bf16 activation out)
# --------------------------------------------------------------------------------------
def _value_proj_kernel(x_ref, w_ref, b_ref, o_ref):
    o_ref[0] = (jnp.dot(x_ref[0], w_ref[...], preferred_element_type=jnp.float32)
                + b_ref[...]).astype(o_ref.dtype)


def value_proj_pallas(x_bf16, wv_bf16, bv_f32):
    N, Len_in, C = x_bf16.shape
    t_in = _pick_tile(Len_in)
    grid_spec = pltpu.PrefetchScalarGridSpec(
        num_scalar_prefetch=0,
        grid=(N, Len_in // t_in),
        in_specs=[
            pl.BlockSpec((1, t_in, C), lambda b, i: (b, i, 0)),
            pl.BlockSpec((C, C), lambda b, i: (0, 0)),
            pl.BlockSpec((1, C), lambda b, i: (0, 0)),
        ],
        out_specs=pl.BlockSpec((1, t_in, C), lambda b, i: (b, i, 0)),
    )
    return pl.pallas_call(
        _value_proj_kernel,
        out_shape=jax.ShapeDtypeStruct((N, Len_in, C), jnp.bfloat16),
        grid_spec=grid_spec,
        compiler_params=pltpu.CompilerParams(
            dimension_semantics=("parallel", "parallel")),
    )(x_bf16, wv_bf16, bv_f32)


# --------------------------------------------------------------------------------------
# Main fused attention kernel: one (batch, q-tile) block per grid step.
# --------------------------------------------------------------------------------------
def make_ms_deform_attn_kernel(spatial_shapes, num_heads, num_levels, num_points,
                               embed_dim, tile_q, len_in):
    H, L, P, C = num_heads, num_levels, num_points, embed_dim
    Dh = C // H
    HLP = H * L * P
    LP = L * P

    starts = []
    s = 0
    for (h_l, w_l) in spatial_shapes:
        starts.append(s)
        s += h_l * w_l
    assert s == len_in

    def kernel(q_ref, rx_ref, ry_ref, v_ref,
               wf_ref, bf_ref, wo_ref, bo_ref, o_ref):
        q = q_ref[0]                               # (tile_q, C)  bf16

        # ---- fused sampling_offsets(x|y) + attention_weights projection: 1 MXU pass --
        proj = (jnp.dot(q, wf_ref[...], preferred_element_type=jnp.float32)
                + bf_ref[...])                     # (tile_q, 3*HLP) fp32
        off_x = proj[:, 0 * HLP:1 * HLP]
        off_y = proj[:, 1 * HLP:2 * HLP]
        logits = proj[:, 2 * HLP:3 * HLP]

        # ---- per-head softmax over the L*P sampling slots ---------------------------
        aw = []
        for h in range(H):
            lg = logits[:, h * LP:(h + 1) * LP]
            m = jnp.max(lg, axis=-1, keepdims=True)
            e = jnp.exp(lg - m)
            inv_denom = pl.reciprocal(jnp.sum(e, axis=-1, keepdims=True), approx=True)
            aw.append(e * inv_denom)               # (tile_q, LP)

        head_acc = [jnp.zeros((tile_q, Dh), dtype=jnp.float32) for _ in range(H)]

        for l in range(L):
            h_l, w_l = spatial_shapes[l]
            hw = h_l * w_l
            start = starts[l]
            col_iota = lax.broadcasted_iota(jnp.int32, (tile_q, hw), 1)

            # grid_sample(align_corners=False): x_pix = loc_x*W - 0.5 with
            # loc_x = ref_x + off_x / W   ==>   x_pix = ref_x*W + off_x - 0.5 (folded).
            base_x = rx_ref[0, :, l:l + 1] * float(w_l) - 0.5     # (tile_q, 1)
            base_y = ry_ref[0, :, l:l + 1] * float(h_l) - 0.5

            for h in range(H):
                c0 = h * LP + l * P
                xs = base_x + off_x[:, c0:c0 + P]                 # (tile_q, P)
                ys = base_y + off_y[:, c0:c0 + P]
                x0f = jnp.floor(xs)
                y0f = jnp.floor(ys)
                fx = xs - x0f
                fy = ys - y0f
                x0 = x0f.astype(jnp.int32)
                y0 = y0f.astype(jnp.int32)
                x1 = x0 + 1
                y1 = y0 + 1

                # Fold the softmax attention weight into the y-direction bilinear
                # factors once; corner weights are then single multiplies.
                aw_hl = aw[h][:, l * P:(l + 1) * P]               # (tile_q, P)
                gx = 1.0 - fx
                gy_a = (1.0 - fy) * aw_hl
                fy_a = fy * aw_hl

                # Static ref slice: only the (hw, Dh) tile for this (level, head) is
                # pulled from VMEM, the full (Len_in, C) value never lives in vregs.
                # NOTE: level starts are multiples of 8 for the shapes used here;
                # unaligned starts would fall back to a relayout copy.
                v_lh = v_ref[0, start:start + hw, h * Dh:(h + 1) * Dh]   # (hw, Dh) bf16

                # Fold bilinear weights, zero-padding masks and attention weights
                # into a dense (tile_q, hw) gather matrix, then one MXU matmul
                # per (level, head).
                # TODO(synk): for large levels (hw in the thousands) switch to a
                # DMA/index gather of value rows instead of the dense one-hot matmul.
                gq = jnp.zeros((tile_q, hw), dtype=jnp.float32)
                corners = (
                    (x0, y0, gx * gy_a),
                    (x1, y0, fx * gy_a),
                    (x0, y1, gx * fy_a),
                    (x1, y1, fx * fy_a),
                )
                for (xi, yi, wgt) in corners:
                    inb = (xi >= 0) & (xi < w_l) & (yi >= 0) & (yi < h_l)
                    idx = (jnp.clip(yi, 0, h_l - 1) * w_l
                           + jnp.clip(xi, 0, w_l - 1))            # (tile_q, P) int32
                    # OOB corners get weight 0, so the clipped index is harmless.
                    w_full = jnp.where(inb, wgt, 0.0)             # (tile_q, P)
                    for p in range(P):
                        gq = gq + jnp.where(col_iota == idx[:, p:p + 1],
                                            w_full[:, p:p + 1], 0.0)

                head_acc[h] = head_acc[h] + jnp.dot(
                    gq.astype(jnp.bfloat16), v_lh,
                    preferred_element_type=jnp.float32)

        # ---- lane-dense (tile_q, C) result -> single output_proj matmul + store ------
        acc = jnp.concatenate(head_acc, axis=-1)                  # (tile_q, C) fp32
        out = (jnp.dot(acc.astype(jnp.bfloat16), wo_ref[...],
                       preferred_element_type=jnp.float32) + bo_ref[...])
        o_ref[0] = out.astype(o_ref.dtype)

    return kernel


# --------------------------------------------------------------------------------------
# Wrapper
# --------------------------------------------------------------------------------------
def ms_deform_attn_pallas(query, reference_points, input_flatten, spatial_shapes,
                          params, num_heads, num_levels, num_points):
    N, Len_q, C = query.shape
    _, Len_in, _ = input_flatten.shape
    HLP = num_heads * num_levels * num_points

    # TODO(synk): input_padding_mask (value.masked_fill) not implemented.
    # TODO(synk): reference_points with last dim == 4 (reference boxes) not implemented.
    ref_x = reference_points[..., 0]   # (N, Len_q, L)
    ref_y = reference_points[..., 1]

    # bf16 MXU operands (fp32 accumulation inside the kernels).
    q_bf16 = query.astype(jnp.bfloat16)
    x_bf16 = input_flatten.astype(jnp.bfloat16)
    wv_bf16 = params["wv"].astype(jnp.bfloat16)
    wo_bf16 = params["wo"].astype(jnp.bfloat16)
    w_fused = jnp.concatenate([params["wsx"], params["wsy"], params["wa"]],
                              axis=1).astype(jnp.bfloat16)        # (C, 3*HLP)
    b_fused = jnp.concatenate([params["bsx"], params["bsy"], params["ba"]],
                              axis=1)                             # (1, 3*HLP) fp32

    # value_proj as its own tiled Pallas matmul (value kept as a bf16 activation).
    value = value_proj_pallas(x_bf16, wv_bf16, params["bv"])      # (N, Len_in, C) bf16

    # q-tiling: largest of 512/256/128 rows when divisible, otherwise the full Len_q.
    tile_q = _pick_tile(Len_q, (128,))
    nq = Len_q // tile_q

    kernel = make_ms_deform_attn_kernel(spatial_shapes, num_heads, num_levels,
                                        num_points, C, tile_q, Len_in)

    grid_spec = pltpu.PrefetchScalarGridSpec(
        num_scalar_prefetch=0,
        grid=(N, nq),
        in_specs=[
            pl.BlockSpec((1, tile_q, C), lambda b, qi: (b, qi, 0)),           # query (bf16)
            pl.BlockSpec((1, tile_q, num_levels), lambda b, qi: (b, qi, 0)),  # ref_x
            pl.BlockSpec((1, tile_q, num_levels), lambda b, qi: (b, qi, 0)),  # ref_y
            pl.BlockSpec((1, Len_in, C), lambda b, qi: (b, 0, 0)),            # value (bf16)
            pl.BlockSpec((C, 3 * HLP), lambda b, qi: (0, 0)),                 # fused proj W
            pl.BlockSpec((1, 3 * HLP), lambda b, qi: (0, 0)),                 # fused proj b
            pl.BlockSpec((C, C), lambda b, qi: (0, 0)),                       # output_proj W
            pl.BlockSpec((1, C), lambda b, qi: (0, 0)),                       # output_proj b
        ],
        out_specs=pl.BlockSpec((1, tile_q, C), lambda b, qi: (b, qi, 0)),
    )
    f = pl.pallas_call(
        kernel,
        out_shape=jax.ShapeDtypeStruct((N, Len_q, C), jnp.float32),
        grid_spec=grid_spec,
        compiler_params=pltpu.CompilerParams(
            dimension_semantics=("parallel", "parallel"),
            vmem_limit_bytes=32 * 1024 * 1024,
        ),
    )
    return f(q_bf16, ref_x, ref_y, value, w_fused, b_fused, wo_bf16, params["bo"])


# --------------------------------------------------------------------------------------
# Pure-JAX fp32 reference (independent gather path) for validation
# --------------------------------------------------------------------------------------
def ms_deform_attn_ref(query, reference_points, input_flatten, spatial_shapes,
                       params, H, L, P):
    N, Len_q, C = query.shape
    Dh = C // H
    value = input_flatten @ params["wv"] + params["bv"]
    off_x = (query @ params["wsx"] + params["bsx"]).reshape(N, Len_q, H, L, P)
    off_y = (query @ params["wsy"] + params["bsy"]).reshape(N, Len_q, H, L, P)
    logits = (query @ params["wa"] + params["ba"]).reshape(N, Len_q, H, L * P)
    aw = jax.nn.softmax(logits, axis=-1).reshape(N, Len_q, H, L, P)

    Ws = jnp.array([w for (_, w) in spatial_shapes], jnp.float32)
    Hs = jnp.array([h for (h, _) in spatial_shapes], jnp.float32)
    ref_x = reference_points[..., 0][:, :, None, :, None]
    ref_y = reference_points[..., 1][:, :, None, :, None]
    loc_x = ref_x + off_x / Ws[None, None, None, :, None]
    loc_y = ref_y + off_y / Hs[None, None, None, :, None]

    value = value.reshape(N, -1, H, Dh)
    out = jnp.zeros((N, Len_q, H, Dh), jnp.float32)
    start = 0
    for l, (h_l, w_l) in enumerate(spatial_shapes):
        hw = h_l * w_l
        v_l = jnp.transpose(value[:, start:start + hw], (0, 2, 1, 3))   # (N, H, HW, Dh)
        start += hw
        xs = loc_x[:, :, :, l, :] * w_l - 0.5
        ys = loc_y[:, :, :, l, :] * h_l - 0.5
        x0 = jnp.floor(xs); y0 = jnp.floor(ys)
        fx = xs - x0; fy = ys - y0
        x0i = x0.astype(jnp.int32); y0i = y0.astype(jnp.int32)
        aw_l = aw[:, :, :, l, :]
        for (xi, yi, wgt) in [(x0i, y0i, (1 - fx) * (1 - fy)),
                              (x0i + 1, y0i, fx * (1 - fy)),
                              (x0i, y0i + 1, (1 - fx) * fy),
                              (x0i + 1, y0i + 1, fx * fy)]:
            m = ((xi >= 0) & (xi < w_l) & (yi >= 0) & (yi < h_l)).astype(jnp.float32)
            idx = jnp.clip(yi, 0, h_l - 1) * w_l + jnp.clip(xi, 0, w_l - 1)   # (N,Lq,H,P)
            idx_t = jnp.transpose(idx, (0, 2, 1, 3)).reshape(N, value.shape[2], Len_q * P)
            g = jnp.take_along_axis(v_l, idx_t[..., None], axis=2)
            g = g.reshape(N, value.shape[2], Len_q, P, Dh).transpose(0, 2, 1, 3, 4)
            out = out + jnp.sum((wgt * m * aw_l)[..., None] * g, axis=3)
    return out.reshape(N, Len_q, C) @ params["wo"] + params["bo"]


# --------------------------------------------------------------------------------------
# Deterministic parameter init mirroring MSDeformAttn._reset_parameters
# --------------------------------------------------------------------------------------
def init_params(key, C, H, L, P):
    HLP = H * L * P
    k1, k2 = jax.random.split(key)
    a = math.sqrt(6.0 / (C + C))                      # xavier_uniform for square weights
    wv = jax.random.uniform(k1, (C, C), jnp.float32, -a, a)
    wo = jax.random.uniform(k2, (C, C), jnp.float32, -a, a)
    bv = jnp.zeros((1, C), jnp.float32)
    bo = jnp.zeros((1, C), jnp.float32)

    # sampling_offsets: weight = 0, bias = directional grid init
    thetas = jnp.arange(H, dtype=jnp.float32) * (2.0 * math.pi / H)
    grid = jnp.stack([jnp.cos(thetas), jnp.sin(thetas)], -1)             # (H, 2)
    grid = grid / jnp.max(jnp.abs(grid), axis=-1, keepdims=True)
    grid = jnp.tile(grid[:, None, None, :], (1, L, P, 1))                # (H, L, P, 2)
    grid = grid * jnp.arange(1, P + 1, dtype=jnp.float32)[None, None, :, None]
    wsx = jnp.zeros((C, HLP), jnp.float32)
    wsy = jnp.zeros((C, HLP), jnp.float32)
    bsx = grid[..., 0].reshape(1, HLP)
    bsy = grid[..., 1].reshape(1, HLP)

    # attention_weights: weight = 0, bias = 0
    wa = jnp.zeros((C, HLP), jnp.float32)
    ba = jnp.zeros((1, HLP), jnp.float32)
    return dict(wv=wv, bv=bv, wsx=wsx, bsx=bsx, wsy=wsy, bsy=bsy,
                wa=wa, ba=ba, wo=wo, bo=bo)


if __name__ == "__main__":
    N, Len_q = 2, 8
    C, H, L, P = 32, 4, 2, 4
    spatial_shapes = ((8, 8), (4, 4))
    Len_in = sum(h * w for h, w in spatial_shapes)

    key = jax.random.PRNGKey(0)
    kq, kx, kr, kp = jax.random.split(key, 4)
    query = jax.random.normal(kq, (N, Len_q, C), jnp.float32)
    input_flatten = jax.random.normal(kx, (N, Len_in, C), jnp.float32)
    reference_points = jax.random.uniform(kr, (N, Len_q, L, 2), jnp.float32)
    params = init_params(kp, C, H, L, P)

    out = ms_deform_attn_pallas(query, reference_points, input_flatten,
                                spatial_shapes, params, H, L, P)
    out = jax.block_until_ready(out)

    ref = ms_deform_attn_ref(query, reference_points, input_flatten,
                             spatial_shapes, params, H, L, P)

    assert out.shape == (N, Len_q, C)
    # Tolerance loosened vs the fp32 reference because the kernel feeds bf16 operands
    # to the MXU (fp32 accumulation) and uses the approx-EUP reciprocal in softmax.
    if not bool(jnp.allclose(out, ref, atol=5e-2, rtol=5e-2)):
        raise AssertionError(
            f"mismatch, max abs err = {float(jnp.max(jnp.abs(out - ref)))}")
    print("KERNEL_OK")
</pallas_src>

<mosaic_0001>
module attributes {stable_mosaic.version = 11 : i64} {
  func.func @_value_proj_kernel(%arg0: i32, %arg1: i32, %arg2: memref<1x80x32xbf16, #tpu.memory_space<vmem>>, %arg3: memref<32x32xbf16, #tpu.memory_space<vmem>>, %arg4: memref<1x32xf32, #tpu.memory_space<vmem>>, %arg5: memref<1x80x32xbf16, #tpu.memory_space<vmem>>) attributes {dimension_semantics = [#tpu.dimension_semantics<parallel>, #tpu.dimension_semantics<parallel>], iteration_bounds = array<i64: 2, 1>, scalar_prefetch = 0 : i64, scratch_operands = 0 : i64, tpu.core_type = #tpu.core_type<tc>, window_params = [{transform_indices = @transform_0, window_bounds = array<i64: 1, 80, 32>}, {pipeline_mode = #tpu.pipeline_mode<synchronous>, transform_indices = @transform_1, window_bounds = array<i64: 32, 32>}, {pipeline_mode = #tpu.pipeline_mode<synchronous>, transform_indices = @transform_2, window_bounds = array<i64: 1, 32>}, {transform_indices = @transform_3, window_bounds = array<i64: 1, 80, 32>}]} {
    %c0 = arith.constant 0 : index
    %c0_0 = arith.constant 0 : index
    %c0_1 = arith.constant 0 : index
    %0 = vector.load %arg2[%c0, %c0_0, %c0_1] : memref<1x80x32xbf16, #tpu.memory_space<vmem>>, vector<1x80x32xbf16>
    %1 = vector.shape_cast %0 : vector<1x80x32xbf16> to vector<80x32xbf16>
    %c0_2 = arith.constant 0 : index
    %c0_3 = arith.constant 0 : index
    %2 = vector.load %arg3[%c0_2, %c0_3] : memref<32x32xbf16, #tpu.memory_space<vmem>>, vector<32x32xbf16>
    %cst = arith.constant dense<0.000000e+00> : vector<80x32xf32>
    %3 = tpu.matmul %1, %2, %cst {dimension_numbers = #tpu.dot_dimension_numbers<[1], [0], [0], [1], [0, 0, 1, 1], [], []>} : vector<80x32xbf16>, vector<32x32xbf16>, vector<80x32xf32> -> vector<80x32xf32>
    %c0_4 = arith.constant 0 : index
    %c0_5 = arith.constant 0 : index
    %4 = vector.load %arg4[%c0_4, %c0_5] : memref<1x32xf32, #tpu.memory_space<vmem>>, vector<1x32xf32>
    %5 = vector.broadcast %4 : vector<1x32xf32> to vector<80x32xf32>
    %6 = arith.addf %3, %5 : vector<80x32xf32>
    %7 = arith.truncf %6 : vector<80x32xf32> to vector<80x32xbf16>
    %c0_6 = arith.constant 0 : index
    %c0_7 = arith.constant 0 : index
    %c0_8 = arith.constant 0 : index
    %8 = vector.load %arg5[%c0_6, %c0_7, %c0_8] : memref<1x80x32xbf16, #tpu.memory_space<vmem>>, vector<1x80x32xbf16>
    %9 = vector.shape_cast %8 : vector<1x80x32xbf16> to vector<80x32xbf16>
    %10 = vector.shape_cast %7 : vector<80x32xbf16> to vector<1x80x32xbf16>
    tpu.vector_store %arg5[%c0_6, %c0_7, %c0_8], %10 {strides = array<i32>} : memref<1x80x32xbf16, #tpu.memory_space<vmem>>, vector<1x80x32xbf16>,
    return
  }
  func.func @transform_0(%arg0: i32, %arg1: i32) -> (i32, i32, i32) {
    %c0_i32 = arith.constant 0 : i32
    %c0_i32_0 = arith.constant 0 : i32
    return %arg0, %arg1, %c0_i32 : i32, i32, i32
  }
  func.func @transform_1(%arg0: i32, %arg1: i32) -> (i32, i32) {
    %c0_i32 = arith.constant 0 : i32
    %c0_i32_0 = arith.constant 0 : i32
    %c0_i32_1 = arith.constant 0 : i32
    return %c0_i32, %c0_i32_0 : i32, i32
  }
  func.func @transform_2(%arg0: i32, %arg1: i32) -> (i32, i32) {
    %c0_i32 = arith.constant 0 : i32
    %c0_i32_0 = arith.constant 0 : i32
    %c0_i32_1 = arith.constant 0 : i32
    return %c0_i32, %c0_i32_0 : i32, i32
  }
  func.func @transform_3(%arg0: i32, %arg1: i32) -> (i32, i32, i32) {
    %c0_i32 = arith.constant 0 : i32
    %c0_i32_0 = arith.constant 0 : i32
    return %arg0, %arg1, %c0_i32 : i32, i32, i32
  }
}

</mosaic_0001>

<bundles_post_ra>
// kernel: tpu_custom_call.1
= control target key start
LH: loop header
LB: loop body
LE: loop exit
PB: predicated region body
PF: predicated region fallthrough
CT: control target
= control target key end

     0   :  { %s653_s12 = smov 0   ;;  %s655_s13 = smov 0   ;;  %s722_s0 = inlined_call_operand.vmem [shape: bf16[2,80,32], index: 0, kind: input, shape index: {}]   ;;  %s723_s1 = inlined_call_operand.vmem [shape: bf16[32,32], index: 1, kind: input, shape index: {}]   ;;  %s724_s2 = inlined_call_operand.vmem [shape: f32[1,32], index: 2, kind: input, shape index: {}]   ;;  %s725_s3 = inlined_call_operand.vmem [shape: bf16[2,80,32], index: 3, kind: output, shape index: {}]  }
   0x1   :  { %s657_s14 = smov 0  }
   0x2 LB: > { %s25_s15 = sadd.s32 1, %s625_s13  ;;  %p500_p0 = scmp.ge.s32.totalorder %s629_s14, 1  ;;  %s629_s14 = sphi %s657_s14, %s13_s14   ;;  %s625_s13 = sphi %s655_s13, %s727_s13   ;;  %s621_s12 = sphi %s653_s12, %s726_s12  }
   0x3   : > { %p27_p1 = scmp.ge.s32.totalorder %s25_s15, 2  ;;  %p158_p2 = scmp.lt.s32.totalorder %s629_s14, 3 }
   0x5   : > { %s729_s15 = smov (%p27_p1, %s25_s15), 0  ;;  %p159_p3 = pnand %p500_p0, %p158_p2 }
   0x6   : > { %v600_v0 = vld [vmem:[%s723_s1] sm:$0xff] (!%p159_p3)   ;;  %v631_v1 = vmov (!%p159_p3), 0.0   ;;  %v601_v2 = vld [vmem:[%s723_s1 + $0x8] sm:$0xff] (!%p159_p3)   ;;  %p191_p4 = scmp.lt.s32.totalorder (!%p159_p3), %s621_s12, 1  ;;  %vm632_vm0 = vmmov (!%p159_p3), 0   ;;  %vm269_vm1 = vcmask (!%p159_p3), 261120  }
   0x7   : > { %162 = sbr.rel (%p159_p3) target bundleno = 254 (0xfe), region = 32  ;;  %545 = vmatprep.subr.bf16.mxu0 (!%p159_p3), %v631_v1  ;;  %569 = vmatprep.subr.bf16.mxu1 (!%p159_p3), %v631_v1  ;;  %v503_v8 = vld [vmem:[%s724_s2] ss:$0 sm:$0xff] (!%p159_p3)  ;;  %vm398_vm2 = vcmask (!%p159_p3), 257024  }
   0x8   : > { %546 = vmatpush3.bf16.msra.mxu0 (!%p159_p3), %v600_v0  ;;  %571 = vmatpush3.bf16.msra.mxu1 (!%p159_p3), %v600_v0 }
   0x9   : > { %547 = vmatprep.subr.bf16.mxu0 (!%p159_p3), %v631_v1  ;;  %549 = vmatprep.mubr.msk.bf16.mxu0 (!%p159_p3), %vm632_vm0, %v631_v1 }
   0xa   : > { %570 = vmatprep.subr.bf16.mxu1 (!%p159_p3), %v631_v1  ;;  %561 = vmatprep.mubr.msk.bf16.mxu1 (!%p159_p3), %vm632_vm0, %v631_v1 }
   0xc   : > { %548 = vmatpush3.bf16.msra.mxu0 (!%p159_p3), %v601_v2  ;;  %572 = vmatpush3.bf16.msra.mxu1 (!%p159_p3), %v601_v2 }
   0xe   : > { %s731_s12 = smov (!%p191_p4, %s621_s12), 1 }
   0xf   : > { %s573_s20 = smul.u32 40, %s731_s12 }
  0x11   : > { %s198_s23 = scalar_lea.vmem %s722_s0, %s573_s20  ;;  %s691_s28 = scalar_lea.vmem %s725_s3, %s573_s20 }
  0x12   : > { %v602_v3 = vld [vmem:[%s198_s23] sm:$0xff]   ;;  %v603_v4 = vld [vmem:[%s198_s23 + $0x18] sm:$0xff]   ;;  %v604_v5 = vld [vmem:[%s198_s23 + $0x8] sm:$0xff]  }
  0x13   : > { %550 = vmatmul.mubr.msk.bf16.vlgmr.msra.gmra.mrb[0].mxu0 %vm269_vm1, %v602_v3  ;;  %562 = vmatmul.mubr.msk.bf16.vlgmr.msra.gmra.mrb[0].mxu1 %vm269_vm1, %v603_v4  ;;  %v605_v6 = vld [vmem:[%s198_s23 + $0x20] sm:$0xff]   ;;  %v606_v7 = vld [vmem:[%s198_s23 + $0x10] sm:$0xff]  }
  0x14   : > { %553 = vmatprep.mubr.msk.bf16.mxu0 %vm632_vm0, %v631_v1  ;;  %565 = vmatprep.mubr.msk.bf16.mxu1 %vm632_vm0, %v631_v1 }
  0x1b   : > { %554 = vmatmul.mubr.msk.bf16.gmra.mrb[4].mxu0 %vm269_vm1, %v604_v5  ;;  %566 = vmatmul.mubr.msk.bf16.gmra.mrb[4].mxu1 %vm269_vm1, %v605_v6 }
  0x1c   : > { %557 = vmatprep.mubr.msk.bf16.mxu0 %vm632_vm0, %v631_v1 }
  0x23   : > { %558 = vmatmul.mubr.msk.bf16.gmra.mrb[8].mxu0 %vm269_vm1, %v606_v7 }
  0xe6   : > { %v319_v9 = vpop.f32.mrb[0].mxu0  ;;  %v343_v12 = vpop.f32.mrb[0].mxu1 }
  0xe7   : > { %v320_v10 = vadd.f32 %v503_v8, %v319_v9  ;;  %v551_v11 = vpop.f32.mrb[1].mxu0  ;;  %v344_v14 = vadd.f32 %v503_v8, %v343_v12  ;;  %v563_v15 = vpop.f32.mrb[1].mxu1 }
  0xe8   : > { %v322_v13 = vpop.f32.mrb[2].mxu0  ;;  %v346_v19 = vpop.f32.mrb[2].mxu1 }
  0xe9   : > { %v528_v16 = vpack.c.bf16 %v320_v10, %v320_v10  ;;  %v323_v17 = vadd.f32 %v503_v8, %v322_v13  ;;  %v552_v18 = vpop.f32.mrb[3].mxu0  ;;  %v534_v20 = vpack.c.bf16 %v344_v14, %v344_v14  ;;  %v347_v21 = vadd.f32 %v503_v8, %v346_v19  ;;  %v564_v22 = vpop.f32.mrb[3].mxu1 }
  0xeb   : > { %399 = vst.msk [vmem:[%s691_s28] sm:$0xf] %vm398_vm2, %v528_v16  ;;  %v529_v23 = vpack.c.bf16 %v323_v17, %v323_v17  ;;  %405 = vst.msk [vmem:[%s691_s28 + $0x18] sm:$0xf] %vm398_vm2, %v534_v20  ;;  %v535_v24 = vpack.c.bf16 %v347_v21, %v347_v21 }
  0xed   : > { %400 = vst.msk [vmem:[%s691_s28 + $0x4] sm:$0xf] %vm398_vm2, %v529_v23  ;;  %406 = vst.msk [vmem:[%s691_s28 + $0x1c] sm:$0xf] %vm398_vm2, %v535_v24 }
  0xee   : > { %v327_v25 = vpop.f32.mrb[4].mxu0  ;;  %v351_v28 = vpop.f32.mrb[4].mxu1 }
  0xef   : > { %v328_v26 = vadd.f32 %v503_v8, %v327_v25  ;;  %v555_v27 = vpop.f32.mrb[5].mxu0  ;;  %v352_v30 = vadd.f32 %v503_v8, %v351_v28  ;;  %v567_v31 = vpop.f32.mrb[5].mxu1 }
  0xf0   : > { %v330_v29 = vpop.f32.mrb[6].mxu0  ;;  %v354_v35 = vpop.f32.mrb[6].mxu1 }
  0xf1   : > { %v530_v32 = vpack.c.bf16 %v328_v26, %v328_v26  ;;  %v331_v33 = vadd.f32 %v503_v8, %v330_v29  ;;  %v556_v34 = vpop.f32.mrb[7].mxu0  ;;  %v536_v36 = vpack.c.bf16 %v352_v30, %v352_v30  ;;  %v355_v37 = vadd.f32 %v503_v8, %v354_v35  ;;  %v568_v38 = vpop.f32.mrb[7].mxu1 }
  0xf3   : > { %401 = vst.msk [vmem:[%s691_s28 + $0x8] sm:$0xf] %vm398_vm2, %v530_v32  ;;  %v531_v39 = vpack.c.bf16 %v331_v33, %v331_v33  ;;  %407 = vst.msk [vmem:[%s691_s28 + $0x20] sm:$0xf] %vm398_vm2, %v536_v36  ;;  %v537_v40 = vpack.c.bf16 %v355_v37, %v355_v37 }
  0xf5   : > { %402 = vst.msk [vmem:[%s691_s28 + $0xc] sm:$0xf] %vm398_vm2, %v531_v39  ;;  %408 = vst.msk [vmem:[%s691_s28 + $0x24] sm:$0xf] %vm398_vm2, %v537_v40 }
  0xf6   : > { %v335_v41 = vpop.f32.mrb[8].mxu0 }
  0xf7   : > { %v336_v42 = vadd.f32 %v503_v8, %v335_v41  ;;  %v559_v43 = vpop.f32.mrb[9].mxu0 }
  0xf8   : > { %v338_v44 = vpop.f32.mrb[10].mxu0 }
  0xf9   : > { %v532_v45 = vpack.c.bf16 %v336_v42, %v336_v42  ;;  %v339_v46 = vadd.f32 %v503_v8, %v338_v44  ;;  %v560_v47 = vpop.f32.mrb[11].mxu0 }
  0xfb   : > { %403 = vst.msk [vmem:[%s691_s28 + $0x10] sm:$0xf] %vm398_vm2, %v532_v45  ;;  %v533_v48 = vpack.c.bf16 %v339_v46, %v339_v46 }
  0xfd   : > { %404 = vst.msk [vmem:[%s691_s28 + $0x14] sm:$0xf] %vm398_vm2, %v533_v48 }
  0xfe PF: > { %s13_s14 = sadd.s32 1, %s629_s14   ;;  %s726_s12 = smov %s625_s13 }
  0xff   : > { %p10_p5 = scmp.ge.s32.totalorder %s13_s14, 4   ;;  %s727_s13 = smov %s729_s15 }
 0x101   :  { %12 = sbr.rel (!%p10_p5) target bundleno = 2 (0x2), region = 62 }

</bundles_post_ra>
